<compile_context>
chip_gen: v7x
topology: tpu7x:2x2x1
jax: 0.10.0
libtpu: 0.0.40
codegen_flags: <defaults>
</compile_context>

<pallas_src>
import jax
import jax.numpy as jnp
from jax import lax
from jax.experimental import pallas as pl
from jax.experimental.pallas import tpu as pltpu


def _toy_ae_kernel(x_ref, w_ref, b_ref, out_ref):
    x = x_ref[...]                      # (B, D)  batch on sublanes, features on lanes
    w = w_ref[...]                      # (D, H)
    b = b_ref[...]                      # (1, D)  broadcasts over batch rows
    # encode: h = x @ W   -> (B, H), f32 accumulation on the MXU
    h = jnp.dot(x, w, preferred_element_type=jnp.float32)
    # decode: out = h @ W.T + b  -> (B, D)
    # Contract over H directly (dims ((1,),(1,))) so no transposed copy of W is
    # materialized inside the kernel.
    out = lax.dot_general(
        h, w,
        dimension_numbers=(((1,), (1,)), ((), ())),
        preferred_element_type=jnp.float32,
    ) + b
    out_ref[...] = jnp.maximum(out, 0.0).astype(out_ref.dtype)


def toy_superposition_ae_forward(x, encoder_weights, decoder_bias, *, batch_tile=1024):
    """x: (B, input_dim) f32; encoder_weights: (input_dim, hidden_dim);
    decoder_bias: (input_dim,). Returns relu((x @ W) @ W.T + b), shape (B, input_dim)."""
    B, D = x.shape
    Din, H = encoder_weights.shape
    assert D == Din
    b2d = decoder_bias.reshape(1, D)
    out_shape = jax.ShapeDtypeStruct((B, D), x.dtype)

    if B <= batch_tile:
        # Small-batch path: single gridless kernel invocation, everything
        # VMEM-resident (x:2KB, W:4KB, bias:256B, out:2KB at the demo shapes).
        return pl.pallas_call(
            _toy_ae_kernel,
            out_shape=out_shape,
            in_specs=[
                pl.BlockSpec(memory_space=pltpu.MemorySpace.VMEM),
                pl.BlockSpec(memory_space=pltpu.MemorySpace.VMEM),
                pl.BlockSpec(memory_space=pltpu.MemorySpace.VMEM),
            ],
            out_specs=pl.BlockSpec(memory_space=pltpu.MemorySpace.VMEM),
        )(x, encoder_weights, b2d)

    # Scale-up path (large B): tile only the batch axis; W and bias use a
    # grid-invariant index_map so they are fetched once and stay in VMEM.
    # TODO(synk): at large B on v6e/v7x, cast x/W to bf16 in the wrapper
    # (keep f32 accumulation) for the bf16-native MXU path.
    tb = batch_tile
    return pl.pallas_call(
        _toy_ae_kernel,
        out_shape=out_shape,
        grid=(pl.cdiv(B, tb),),
        in_specs=[
            pl.BlockSpec((tb, D), lambda i: (i, 0)),
            pl.BlockSpec((D, H), lambda i: (0, 0)),
            pl.BlockSpec((1, D), lambda i: (0, 0)),
        ],
        out_specs=pl.BlockSpec((tb, D), lambda i: (i, 0)),
        compiler_params=pltpu.CompilerParams(
            dimension_semantics=("parallel",)),
    )(x, encoder_weights, b2d)


if __name__ == "__main__":
    # Small shapes consistent with the module: batch=8, input_dim=64, hidden_dim=16.
    batch, input_dim, hidden_dim = 8, 64, 16

    key = jax.random.PRNGKey(0)
    kx, kw = jax.random.split(key)

    # Deterministic parameter init (xavier_normal_ on encoder_weights, zeros bias).
    xavier_std = (2.0 / (input_dim + hidden_dim)) ** 0.5
    encoder_weights = xavier_std * jax.random.normal(
        kw, (input_dim, hidden_dim), dtype=jnp.float32)
    decoder_bias = jnp.zeros((input_dim,), dtype=jnp.float32)

    x = jax.random.normal(kx, (batch, input_dim), dtype=jnp.float32)

    out = toy_superposition_ae_forward(x, encoder_weights, decoder_bias)
    out = jax.block_until_ready(out)

    # Reference check in plain JAX.
    ref = jnp.maximum((x @ encoder_weights) @ encoder_weights.T + decoder_bias, 0.0)
    assert out.shape == (batch, input_dim)
    assert jnp.allclose(out, ref, atol=1e-5, rtol=1e-5)

    print("KERNEL_OK")
</pallas_src>

<mosaic_0001>
module attributes {stable_mosaic.version = 11 : i64} {
  func.func @_toy_ae_kernel(%arg0: memref<8x64xf32, #tpu.memory_space<vmem>>, %arg1: memref<64x16xf32, #tpu.memory_space<vmem>>, %arg2: memref<1x64xf32, #tpu.memory_space<vmem>>, %arg3: memref<8x64xf32, #tpu.memory_space<vmem>>) attributes {dimension_semantics = [], scalar_prefetch = 0 : i64, scratch_operands = 0 : i64, tpu.core_type = #tpu.core_type<tc>} {
    %c0 = arith.constant 0 : index
    %c0_0 = arith.constant 0 : index
    %0 = vector.load %arg0[%c0, %c0_0] : memref<8x64xf32, #tpu.memory_space<vmem>>, vector<8x64xf32>
    %c0_1 = arith.constant 0 : index
    %c0_2 = arith.constant 0 : index
    %1 = vector.load %arg1[%c0_1, %c0_2] : memref<64x16xf32, #tpu.memory_space<vmem>>, vector<64x16xf32>
    %c0_3 = arith.constant 0 : index
    %c0_4 = arith.constant 0 : index
    %2 = vector.load %arg2[%c0_3, %c0_4] : memref<1x64xf32, #tpu.memory_space<vmem>>, vector<1x64xf32>
    %cst = arith.constant dense<0.000000e+00> : vector<8x16xf32>
    %3 = tpu.matmul %0, %1, %cst {dimension_numbers = #tpu.dot_dimension_numbers<[1], [0], [0], [1], [0, 0, 1, 1], [], []>} : vector<8x64xf32>, vector<64x16xf32>, vector<8x16xf32> -> vector<8x16xf32>
    %cst_5 = arith.constant dense<0.000000e+00> : vector<8x64xf32>
    %4 = tpu.matmul %3, %1, %cst_5 {dimension_numbers = #tpu.dot_dimension_numbers<[1], [1], [0], [0], [0, 0, 1, 0], [], []>} : vector<8x16xf32>, vector<64x16xf32>, vector<8x64xf32> -> vector<8x64xf32>
    %5 = vector.broadcast %2 : vector<1x64xf32> to vector<8x64xf32>
    %6 = arith.addf %4, %5 : vector<8x64xf32>
    %cst_6 = arith.constant 0.000000e+00 : f32
    %7 = vector.broadcast %cst_6 : f32 to vector<8x64xf32>
    %8 = arith.maximumf %6, %7 : vector<8x64xf32>
    %c0_7 = arith.constant 0 : index
    %c0_8 = arith.constant 0 : index
    %9 = vector.load %arg3[%c0_7, %c0_8] : memref<8x64xf32, #tpu.memory_space<vmem>>, vector<8x64xf32>
    tpu.vector_store %arg3[%c0_7, %c0_8], %8 {strides = array<i32>} : memref<8x64xf32, #tpu.memory_space<vmem>>, vector<8x64xf32>,
    return
  }
}

</mosaic_0001>

<bundles_post_ra>
// kernel: tpu_custom_call.1
= control target key start
LH: loop header
LB: loop body
LE: loop exit
PB: predicated region body
PF: predicated region fallthrough
CT: control target
= control target key end

     0   :  { %v342_v3 = vmov 0.0|0.0   ;;  %vm343_vm0 = vmmov 0   ;;  %v344_v6 = vmov 0.0   ;;  %vm105_vm1 = vcmask 130048   ;;  %s425_s0 = inlined_call_operand.vmem [shape: f32[8,64], index: 0, kind: input, shape index: {}]   ;;  %s426_s1 = inlined_call_operand.vmem [shape: f32[64,16], index: 1, kind: input, shape index: {}]   ;;  %s427_s2 = inlined_call_operand.vmem [shape: f32[1,64], index: 2, kind: input, shape index: {}]   ;;  %s428_s3 = inlined_call_operand.hbm [shape: f32[8,64], index: 3, kind: output, shape index: {}]  }
   0x1   :  { %v16_v0 = vld [vmem:[%s426_s1] sm:$0xff]  ;;  %v17_v1 = vld [vmem:[%s426_s1 + $0x8] sm:$0xff]  ;;  %v18_v2 = vld [vmem:[%s426_s1 + $0x10] sm:$0xff]  ;;  %286 = vmatprep.subr.bf16.mxu0 %v342_v3  ;;  %264 = vmatprep.mubr.msk.f32.mxu0 %vm343_vm0, %v344_v6 }
   0x2   :  { %v287_v4 = vpack.c.bf16 %v17_v1, %v16_v0  ;;  %v19_v5 = vld [vmem:[%s426_s1 + $0x18] sm:$0xff]  ;;  %298 = vmatprep.subr.bf16.mxu1 %v342_v3  ;;  %283 = vmatprep.mubr.msk.f32.mxu1 %vm343_vm0, %v344_v6  ;;  %vm380_vm2 = vmpackc.low %vm105_vm1, %vm105_vm1  ;;  %v20_v9 = vld [vmem:[%s426_s1 + $0x20] sm:$0xff] }
   0x3   :  { %v290_v7 = vpack.c.bf16 %v19_v5, %v18_v2  ;;  %v21_v10 = vld [vmem:[%s426_s1 + $0x28] sm:$0xff] }
   0x4   :  { %288 = vmatpush3.bf16.msra.mxu0 %v287_v4  ;;  %301 = vmatpush3.bf16.xpose.msk.msra.mxu1 %vm380_vm2, %v287_v4 }
   0x5   :  { %289 = vmatprep.subr.bf16.mxu0 %v342_v3 }
   0x6   :  { %8 = vsyncpa [#allocation3], 0  ;;  %302 = vmatprep.subr.bf16.mxu1 %v342_v3  ;;  %v293_v11 = vpack.c.bf16 %v21_v10, %v20_v9  ;;  %v22_v12 = vld [vmem:[%s426_s1 + $0x30] sm:$0xff]  ;;  %v23_v13 = vld [vmem:[%s426_s1 + $0x38] sm:$0xff]  ;;  %vm25_vm3 = vcmask 523264  }
   0x7   :  { %v296_v14 = vpack.c.bf16 %v23_v13, %v22_v12  ;;  %v15_v15 = vld [vmem:[%s425_s0] sm:$0xff]  ;;  %s345_s0 = smov [#allocation2]  }
   0x8   :  { %291 = vmatpush3.bf16.msra.mxu0 %v290_v7  ;;  %v220_v18 = vld [vmem:[%s427_s2] ss:$0 sm:$0xff]  ;;  %s211_s4 = sshll.u32 %s345_s0, 4  ;;  %s212_s4 = int_to_ptr.vmem [resolvable:$true] %s211_s4 }
   0x9   :  { %292 = vmatprep.subr.bf16.mxu0 %v342_v3  ;;  %s318_s5 = scalar_lea.vmem %s212_s4, 128  ;;  %p323_p1 = scmp.lt.s32.totalorder %s212_s4, %s212_s4 }
   0xa   :  { %p319_p0 = scmp.ne.s32.totalorder %s212_s4, %s318_s5  ;;  %p324_p2 = scmp.lt.s32.totalorder %s318_s5, %s318_s5 }
   0xc   :  { %294 = vmatpush3.bf16.msra.mxu0 %v293_v11  ;;  %305 = vmatpush3.bf16.xpose.msk.msra.mxu1 %vm380_vm2, %v290_v7  ;;  %p325_p3 = por %p324_p2, %p323_p1 }
   0xd   :  { %295 = vmatprep.subr.bf16.mxu0 %v342_v3  ;;  %306 = vmatprep.subr.bf16.mxu1 %v342_v3 }
   0xe   :  { %p326_p4 = pnand %p325_p3, %p319_p0 }
  0x10   :  { %297 = vmatpush3.bf16.msra.mxu0 %v296_v14 }
  0x13   :  { %265 = vmatmul.mubr.msk.f32.vlgmr.msra.gmra.mrb[0].mxu0 %vm25_vm3, %v15_v15 }
  0x14   :  { %309 = vmatpush3.bf16.xpose.msk.msra.mxu1 %vm380_vm2, %v293_v11 }
  0x15   :  { %310 = vmatprep.subr.bf16.mxu1 %v342_v3 }
  0x1c   :  { %313 = vmatpush3.bf16.xpose.msk.msra.mxu1 %vm380_vm2, %v296_v14 }
  0xe6   :  { %v95_v16 = vpop.f32.mrb[0].mxu0 }
  0xe7   :  { %v266_v17 = vpop.f32.mrb[1].mxu0  ;;  %284 = vmatmul.mubr.msk.f32.vlgmr.msra.gmra.mrb[0].mxu1 %vm105_vm1, %v95_v16 }
 0x1ba   :  { %v199_v19 = vpop.f32.mrb[0].mxu1 }
 0x1bb   :  { %v200_v20 = vadd.f32 %v220_v18, %v199_v19  ;;  %v285_v21 = vpop.f32.mrb[1].mxu1 }
 0x1bd   :  { %v203_v22 = vmax.f32 %v200_v20, 0.0 }
 0x1bf   :  { %204 = vst.msk [vmem:[#allocation2] sm:$0xff] %vm25_vm3, %v203_v22 }
 0x1c0   :  { %329 = shalt.err (!%p326_p4)
}
 0x1c1   :  { %s330_s2 = scalar_lea.hbm %s428_s3, 128 }
 0x1c2   :  { %p331_p5 = scmp.ne.s32.totalorder %s428_s3, %s330_s2  ;;  %p334_p6 = scmp.lt.u32.totalorder %s330_s2, %s428_s3 }
 0x1c4   :  { %p336_p7 = pnand %p334_p6, %p331_p5 }
 0x1c6   :  { %339 = shalt.err (!%p336_p7)
}
 0x1c7   :  { %214 = dma.vmem_to_hbm [thread:$0]  %s212_s4, 128, %s428_s3, [#allocation3]  }
 0x1c8   :  { %340 = dma.done.wait [#allocation3], 128  }
 0x1c9   :  { %341 = vsyncadd [#allocation3], 4294967168 }
 0x1ca   :  { %218 = vsyncpa [#allocation3], 1 }

</bundles_post_ra>
